<compile_context>
chip_gen: v7x
topology: tpu7x:2x2x1
jax: 0.10.0
libtpu: 0.0.40
codegen_flags: <defaults>
</compile_context>

<pallas_src>
import functools
import math

import jax
import jax.numpy as jnp
from jax.experimental import pallas as pl
from jax.experimental.pallas import tpu as pltpu

DIM = 50          # Config().dim
BATCH_TILE = 128  # lanes per tile; raise to 512-2048 rows for large batches


def transe_loss_kernel(ph_ref, pr_ref, pt_ref, nh_ref, nr_ref, nt_ref,
                       out_ref, *, gamma):
    """Per-tile relu(gamma + ||pos_dis||_1 - ||neg_dis||_1).

    *_ref   : VMEM [DIM, TB] gathered embeddings, batch on the lane axis.
    out_ref : VMEM [1, TB]   per-example hinge values (lane-dense).
    gamma   : Python float margin, baked in at trace time.
    """
    f32 = jnp.float32
    pos_dis = (ph_ref[...].astype(f32) + pr_ref[...].astype(f32)
               - pt_ref[...].astype(f32))                          # [D, TB]
    neg_dis = (nh_ref[...].astype(f32) + nr_ref[...].astype(f32)
               - nt_ref[...].astype(f32))                          # [D, TB]
    # L1 norm along the embedding dim = sublane (axis-0) reduce -> [1, TB].
    pos_norm = jnp.sum(jnp.abs(pos_dis), axis=0, keepdims=True)
    neg_norm = jnp.sum(jnp.abs(neg_dis), axis=0, keepdims=True)
    out_ref[...] = jnp.maximum(gamma + pos_norm - neg_norm, 0.0)


def transe_forward(entity_emb, relation_emb, gamma,
                   pos_head, pos_relation, pos_tail,
                   neg_head, neg_relation, neg_tail, *, batch_tile=BATCH_TILE):
    batch = pos_head.shape[0]
    dim = entity_emb.shape[1]

    num_tiles = pl.cdiv(batch, batch_tile)
    b_pad = num_tiles * batch_tile

    def pad(idx):
        # Pad with index 0 (a valid row); padded columns are dropped below.
        return jnp.pad(idx, (0, b_pad - batch))

    # Embedding lookups stay in plain-JAX glue; transposed so the batch lands
    # on the 128-wide lane axis inside the kernel.
    # TODO(synk): fuse the gather into the kernel (PrefetchScalarGridSpec with
    # the index arrays in SMEM + manual pltpu.make_async_copy row DMAs from
    # tables left at memory_space=pl.ANY) to avoid writing the six gathered
    # [B, dim] intermediates to HBM and reading them back.
    ph = entity_emb[pad(pos_head)].T          # [dim, b_pad]
    pr = relation_emb[pad(pos_relation)].T
    pt = entity_emb[pad(pos_tail)].T
    nh = entity_emb[pad(neg_head)].T
    nr = relation_emb[pad(neg_relation)].T
    nt = entity_emb[pad(neg_tail)].T

    in_spec = pl.BlockSpec((dim, batch_tile), lambda i: (0, i))
    out_spec = pl.BlockSpec((1, batch_tile), lambda i: (0, i))

    per_example = pl.pallas_call(
        functools.partial(transe_loss_kernel, gamma=float(gamma)),
        out_shape=jax.ShapeDtypeStruct((1, b_pad), jnp.float32),
        grid=(num_tiles,),
        in_specs=[in_spec] * 6,
        out_specs=out_spec,
        compiler_params=pltpu.CompilerParams(
            # Disjoint output tiles -> the batch axis can be sharded across
            # TensorCores on megacore parts (v7x); harmless on v5e/v6e.
            dimension_semantics=("parallel",),
            # 6 inputs x 2 pipeline buffers x (dim x batch_tile) f32 is tiny;
            # explicit cap also stays within v7x's 64 MiB physical VMEM.
            vmem_limit_bytes=32 * 1024 * 1024,
        ),
    )(ph, pr, pt, nh, nr, nt)

    # Drop padded columns; the final scalar reduction over <= batch floats is
    # negligible and stays in plain JAX.
    return jnp.sum(per_example[0, :batch])


def init_params(key, entity_num, relation_num, dim=DIM):
    bound = 6.0 / math.sqrt(dim)
    k_e, k_r = jax.random.split(key)
    entity_emb = jax.random.uniform(
        k_e, (entity_num, dim), minval=-bound, maxval=bound, dtype=jnp.float32)
    relation_emb = jax.random.uniform(
        k_r, (relation_num, dim), minval=-bound, maxval=bound, dtype=jnp.float32)
    # __init__ normalizes relation embeddings by their row-wise L2 norm.
    rel_norm = jnp.linalg.norm(relation_emb, axis=1, keepdims=True)
    relation_emb = relation_emb / rel_norm
    return entity_emb, relation_emb


if __name__ == "__main__":
    entity_num = 64
    relation_num = 16
    batch = 300   # deliberately not a tile multiple -> exercises padding path

    key = jax.random.PRNGKey(0)
    k_params, k_ph, k_pr, k_pt, k_nh, k_nr, k_nt = jax.random.split(key, 7)

    entity_emb, relation_emb = init_params(k_params, entity_num, relation_num)
    gamma = 1.0   # fixed margin (torch: FloatTensor([1]))

    pos_head = jax.random.randint(k_ph, (batch,), 0, entity_num, dtype=jnp.int32)
    pos_relation = jax.random.randint(k_pr, (batch,), 0, relation_num, dtype=jnp.int32)
    pos_tail = jax.random.randint(k_pt, (batch,), 0, entity_num, dtype=jnp.int32)
    neg_head = jax.random.randint(k_nh, (batch,), 0, entity_num, dtype=jnp.int32)
    neg_relation = jax.random.randint(k_nr, (batch,), 0, relation_num, dtype=jnp.int32)
    neg_tail = jax.random.randint(k_nt, (batch,), 0, entity_num, dtype=jnp.int32)

    loss = transe_forward(entity_emb, relation_emb, gamma,
                          pos_head, pos_relation, pos_tail,
                          neg_head, neg_relation, neg_tail)
    loss = jax.block_until_ready(loss)

    # Reference check in plain JAX (same semantics as the torch forward).
    def ref_loss():
        pos_dis = (entity_emb[pos_head] + relation_emb[pos_relation]
                   - entity_emb[pos_tail])
        neg_dis = (entity_emb[neg_head] + relation_emb[neg_relation]
                   - entity_emb[neg_tail])
        diff = (gamma + jnp.sum(jnp.abs(pos_dis), axis=1)
                - jnp.sum(jnp.abs(neg_dis), axis=1))
        return jnp.sum(jnp.maximum(diff, 0.0))

    ref = jax.block_until_ready(ref_loss())
    assert jnp.allclose(loss, ref, rtol=1e-4, atol=1e-3), (loss, ref)

    print("KERNEL_OK")
</pallas_src>

<mosaic_0001>
module attributes {stable_mosaic.version = 11 : i64} {
  func.func @transe_loss_kernel(%arg0: i32, %arg1: memref<50x128xf32, #tpu.memory_space<vmem>>, %arg2: memref<50x128xf32, #tpu.memory_space<vmem>>, %arg3: memref<50x128xf32, #tpu.memory_space<vmem>>, %arg4: memref<50x128xf32, #tpu.memory_space<vmem>>, %arg5: memref<50x128xf32, #tpu.memory_space<vmem>>, %arg6: memref<50x128xf32, #tpu.memory_space<vmem>>, %arg7: memref<1x128xf32, #tpu.memory_space<vmem>>) attributes {dimension_semantics = [#tpu.dimension_semantics<parallel>], iteration_bounds = array<i64: 3>, scalar_prefetch = 0 : i64, scratch_operands = 0 : i64, tpu.core_type = #tpu.core_type<tc>, window_params = [{transform_indices = @transform_0, window_bounds = array<i64: 50, 128>}, {transform_indices = @transform_1, window_bounds = array<i64: 50, 128>}, {transform_indices = @transform_2, window_bounds = array<i64: 50, 128>}, {transform_indices = @transform_3, window_bounds = array<i64: 50, 128>}, {transform_indices = @transform_4, window_bounds = array<i64: 50, 128>}, {transform_indices = @transform_5, window_bounds = array<i64: 50, 128>}, {transform_indices = @transform_6, window_bounds = array<i64: 1, 128>}]} {
    %c0 = arith.constant 0 : index
    %c0_0 = arith.constant 0 : index
    %0 = vector.load %arg1[%c0, %c0_0] : memref<50x128xf32, #tpu.memory_space<vmem>>, vector<50x128xf32>
    %c0_1 = arith.constant 0 : index
    %c0_2 = arith.constant 0 : index
    %1 = vector.load %arg2[%c0_1, %c0_2] : memref<50x128xf32, #tpu.memory_space<vmem>>, vector<50x128xf32>
    %2 = arith.addf %0, %1 : vector<50x128xf32>
    %c0_3 = arith.constant 0 : index
    %c0_4 = arith.constant 0 : index
    %3 = vector.load %arg3[%c0_3, %c0_4] : memref<50x128xf32, #tpu.memory_space<vmem>>, vector<50x128xf32>
    %4 = arith.subf %2, %3 : vector<50x128xf32>
    %c0_5 = arith.constant 0 : index
    %c0_6 = arith.constant 0 : index
    %5 = vector.load %arg4[%c0_5, %c0_6] : memref<50x128xf32, #tpu.memory_space<vmem>>, vector<50x128xf32>
    %c0_7 = arith.constant 0 : index
    %c0_8 = arith.constant 0 : index
    %6 = vector.load %arg5[%c0_7, %c0_8] : memref<50x128xf32, #tpu.memory_space<vmem>>, vector<50x128xf32>
    %7 = arith.addf %5, %6 : vector<50x128xf32>
    %c0_9 = arith.constant 0 : index
    %c0_10 = arith.constant 0 : index
    %8 = vector.load %arg6[%c0_9, %c0_10] : memref<50x128xf32, #tpu.memory_space<vmem>>, vector<50x128xf32>
    %9 = arith.subf %7, %8 : vector<50x128xf32>
    %10 = math.absf %4 : vector<50x128xf32>
    %cst = arith.constant dense<0.000000e+00> : vector<128xf32>
    %11 = vector.multi_reduction <add>, %10, %cst [0] : vector<50x128xf32> to vector<128xf32>
    %12 = vector.shape_cast %11 : vector<128xf32> to vector<1x128xf32>
    %13 = math.absf %9 : vector<50x128xf32>
    %cst_11 = arith.constant dense<0.000000e+00> : vector<128xf32>
    %14 = vector.multi_reduction <add>, %13, %cst_11 [0] : vector<50x128xf32> to vector<128xf32>
    %15 = vector.shape_cast %14 : vector<128xf32> to vector<1x128xf32>
    %cst_12 = arith.constant 1.000000e+00 : f32
    %16 = vector.broadcast %cst_12 : f32 to vector<1x128xf32>
    %17 = arith.addf %16, %12 : vector<1x128xf32>
    %18 = arith.subf %17, %15 : vector<1x128xf32>
    %cst_13 = arith.constant 0.000000e+00 : f32
    %19 = vector.broadcast %cst_13 : f32 to vector<1x128xf32>
    %20 = arith.maximumf %18, %19 : vector<1x128xf32>
    %c0_14 = arith.constant 0 : index
    %c0_15 = arith.constant 0 : index
    %21 = vector.load %arg7[%c0_14, %c0_15] : memref<1x128xf32, #tpu.memory_space<vmem>>, vector<1x128xf32>
    tpu.vector_store %arg7[%c0_14, %c0_15], %20 {strides = array<i32>} : memref<1x128xf32, #tpu.memory_space<vmem>>, vector<1x128xf32>,
    return
  }
  func.func @transform_0(%arg0: i32) -> (i32, i32) {
    %c0_i32 = arith.constant 0 : i32
    %c0_i32_0 = arith.constant 0 : i32
    return %c0_i32, %arg0 : i32, i32
  }
  func.func @transform_1(%arg0: i32) -> (i32, i32) {
    %c0_i32 = arith.constant 0 : i32
    %c0_i32_0 = arith.constant 0 : i32
    return %c0_i32, %arg0 : i32, i32
  }
  func.func @transform_2(%arg0: i32) -> (i32, i32) {
    %c0_i32 = arith.constant 0 : i32
    %c0_i32_0 = arith.constant 0 : i32
    return %c0_i32, %arg0 : i32, i32
  }
  func.func @transform_3(%arg0: i32) -> (i32, i32) {
    %c0_i32 = arith.constant 0 : i32
    %c0_i32_0 = arith.constant 0 : i32
    return %c0_i32, %arg0 : i32, i32
  }
  func.func @transform_4(%arg0: i32) -> (i32, i32) {
    %c0_i32 = arith.constant 0 : i32
    %c0_i32_0 = arith.constant 0 : i32
    return %c0_i32, %arg0 : i32, i32
  }
  func.func @transform_5(%arg0: i32) -> (i32, i32) {
    %c0_i32 = arith.constant 0 : i32
    %c0_i32_0 = arith.constant 0 : i32
    return %c0_i32, %arg0 : i32, i32
  }
  func.func @transform_6(%arg0: i32) -> (i32, i32) {
    %c0_i32 = arith.constant 0 : i32
    %c0_i32_0 = arith.constant 0 : i32
    return %c0_i32, %arg0 : i32, i32
  }
}

</mosaic_0001>

<bundles_post_ra>
// kernel: tpu_custom_call.1
= control target key start
LH: loop header
LB: loop body
LE: loop exit
PB: predicated region body
PF: predicated region fallthrough
CT: control target
= control target key end

     0   :  { %s1569_s0 = inlined_call_operand.hbm [shape: f32[50,384], index: 0, kind: input, shape index: {}]   ;;  %s1570_s1 = inlined_call_operand.hbm [shape: f32[50,384], index: 1, kind: input, shape index: {}]   ;;  %s1571_s2 = inlined_call_operand.hbm [shape: f32[50,384], index: 2, kind: input, shape index: {}]   ;;  %s1572_s3 = inlined_call_operand.hbm [shape: f32[50,384], index: 3, kind: input, shape index: {}]   ;;  %s1573_s4 = inlined_call_operand.hbm [shape: f32[50,384], index: 4, kind: input, shape index: {}]   ;;  %s1574_s5 = inlined_call_operand.hbm [shape: f32[50,384], index: 5, kind: input, shape index: {}]   ;;  %s1575_s6 = inlined_call_operand.hbm [shape: f32[1,384], index: 6, kind: output, shape index: {}]  }
   0x1   :  { %1590 = sst [smem:[#allocation24_spill]] %s1570_s1 }
   0x2   :  { %1591 = sst [smem:[#allocation25_spill]] %s1572_s3 }
   0x3   :  { %11 = vsyncpa [#allocation3], 0 }
   0x4   :  { %13 = vsyncpa [#allocation3 + $0x1], 0 }
   0x5   :  { %14 = vsyncpa [#allocation6], 0 }
   0x6   :  { %16 = vsyncpa [#allocation6 + $0x1], 0 }
   0x7   :  { %17 = vsyncpa [#allocation9], 0 }
   0x8   :  { %19 = vsyncpa [#allocation9 + $0x1], 0 }
   0x9   :  { %20 = vsyncpa [#allocation12], 0 }
   0xa   :  { %22 = vsyncpa [#allocation12 + $0x1], 0 }
   0xb   :  { %23 = vsyncpa [#allocation4], 0 }
   0xc   :  { %25 = vsyncpa [#allocation4 + $0x1], 0  ;;  %s1159_s21 = smov 0   ;;  %s1161_s22 = smov 0  }
   0xd   :  { %s1163_s23 = smov 0   ;;  %s1165_s24 = smov 0  }
   0xe LB: > { %1592 = sst [smem:[#allocation19_spill]] %s1100_s21  ;;  %s1180_s25 = sadd.s32 4294967295, %s1112_s24   ;;  %s1112_s24 = sphi %s1165_s24, %s1617_s24   ;;  %s1108_s23 = sphi %s1163_s23, %s1619_s23   ;;  %s1104_s22 = sphi %s1161_s22, %s1621_s22   ;;  %s1100_s21 = sphi %s1159_s21, %s1620_s21  }
   0xf   : > { %1593 = sst [smem:[#allocation20_spill]] %s1108_s23  ;;  %s760_s26 = sadd.s32 4294967294, %s1112_s24  }
  0x10   : > { %s1184_s27 = sadd.s32 1, %s1112_s24   ;;  %s38_s28 = sadd.s32 1, %s1108_s23 }
  0x11   : > { %1594 = sst [smem:[#allocation21_spill]] %s1184_s27  ;;  %s35_s29 = ssub.s32 %s1112_s24, %s1184_s27 }
  0x12   : > { %p45_p0 = scmp.ne.s32.totalorder %s1108_s23, %s1104_s22  ;;  %p36_p1 = scmp.eq.s32.totalorder %s35_s29, 0 }
  0x13   : > { %p46_p2 = scmp.eq.s32.totalorder %s1112_s24, 0  ;;  %p51_p3 = scmp.ne.s32.totalorder %s1104_s22, %s1100_s21 }
  0x14   : > { %p52_p4 = scmp.eq.s32.totalorder %s1180_s25, 0  ;;  %p205_p7 = scmp.eq.s32.totalorder %s1180_s25, 2 }
  0x15   : > { %s1196_s30 = scalar_select %p36_p1, %s1108_s23, %s38_s28  }
  0x16   : > { %p47_p5 = por %p46_p2, %p45_p0  ;;  %p1198_p6 = por %p52_p4, %p51_p3 }
  0x17   : > { %1595 = sst [smem:[#allocation22_spill]] %s1196_s30  ;;  %p211_p8 = scmp.eq.s32.totalorder %s760_s26, 2 }
  0x18   : > { %s1596_s7 = scalar_select %p1198_p6, 1, 0 }
  0x19   : > { %p817_p9 = scmp.lt.s32.totalorder %s1112_s24, 3  ;;  %p1204_p10 = por %p205_p7, %p45_p0 }
  0x1a   : > { %p1208_p11 = por %p211_p8, %p51_p3  ;;  %s1213_s10 = sand.u32 1, %s1108_s23  }
  0x1b   : > { %s1597_s8 = scalar_select %p1204_p10, 1, 0 }
  0x1c   : > { %s1598_s9 = scalar_select %p1208_p11, 1, 0 }
  0x1d   : > { %s1216_s11 = sshll.u32 %s1112_s24, 7  ;;  %s1219_s12 = smul.u32 56, %s1213_s10 }
  0x1e   : > { %1599 = sst [smem:[#allocation23_spill]] %s1598_s9  ;;  %p1221_p12 = pnand %p817_p9, %p47_p5 }
  0x1f   : > { %s1576_s14 = sand.u32 1, %s1112_s24   ;;  %s1601_s1 = sld [smem:[#allocation24_spill]] }
  0x20   : > { %s255_s18 = scalar_lea.vmem [#allocation5], %s1219_s12  ;;  %s1239_s20 = scalar_lea.sflag [#allocation6], %s1576_s14 }
  0x21   : > { %s261_s19 = sshll.u32 %s255_s18, 4  ;;  %p1245_p2 = pneg %p1221_p12  ;;  %s1234_s19 = int_to_ptr.vmem [resolvable:$true] %s261_s19 }
  0x25   : > { %s1230_s17 = scalar_lea.hbm %s1601_s1, %s1216_s11  ;;  %s859_s16 = scalar_lea.hbm %s1601_s1, 2688 }
  0x26   : > { %s854_s26 = scalar_lea.hbm %s1230_s17, 896  ;;  %p860_p5 = scmp.lt.u32.totalorder %s1230_s17, %s1601_s1 }
  0x27   : > { %p855_p1 = scmp.ne.s32.totalorder %s1230_s17, %s854_s26  ;;  %p861_p7 = scmp.lt.u32.totalorder %s859_s16, %s854_s26 }
  0x28   : > { %p863_p9 = scmp.lt.u32.totalorder %s854_s26, %s1230_s17 }
  0x29   : > { %p857_p3 = pnand %p1245_p2, %p855_p1  ;;  %p862_p8 = por %p861_p7, %p860_p5 }
  0x2b   : > { %p858_p4 = pneg %p857_p3  ;;  %p864_p13 = por %p863_p9, %p862_p8 }
  0x2d   : > { %p865_p0 = pnand %p864_p13, %p858_p4 }
  0x2f   : > { %868 = shalt.err (!%p865_p0)
}
  0x30   : > { %s869_s14 = scalar_lea.vmem %s1234_s19, 896  ;;  %s1114_s29 = smov [#allocation5]  }
  0x31   : > { %p870_p1 = scmp.ne.s32.totalorder %s1234_s19, %s869_s14  ;;  %s874_s15 = sshll.u32 %s1114_s29, 4  ;;  %s875_s15 = int_to_ptr.vmem [resolvable:$false] %s874_s15 }
  0x32   : > { %s876_s30 = scalar_lea.vmem %s875_s15, 1792  ;;  %p877_p10 = scmp.lt.s32.totalorder %s1234_s19, %s875_s15 }
  0x33   : > { %p872_p3 = pnand %p870_p1, %p1245_p2  ;;  %p878_p6 = scmp.lt.s32.totalorder %s876_s30, %s869_s14 }
  0x35   : > { %p873_p11 = pneg %p872_p3  ;;  %p879_p5 = por %p878_p6, %p877_p10 }
  0x37   : > { %p880_p7 = pnand %p879_p5, %p873_p11 }
  0x39   : > { %883 = shalt.err (!%p880_p7)
}
  0x3a   : > { %s1580_s26 = smov 384   ;;  %s1582_s16 = smov 128  }
  0x3b   : > { %s1584_s18 = smov 8   ;;  %p1603_p6 = scmp.lt.s32.totalorder %s1112_s24, 4 }
  0x3c   : > { %800 = dma.hbm_to_vmem [thread:$0]  (!%p1221_p12), %s1230_s17, 896, %s1234_s19, %s1239_s20, %s1580_s26, %s1582_s16, %s1584_s18  }
  0x3d   : > { %p1604_p10 = scmp.ge.s32.totalorder %s1112_s24, 1  ;;  %s1606_s3 = sld [smem:[#allocation25_spill]] }
  0x3e   : > { %s295_s1 = scalar_lea.vmem [#allocation8], %s1219_s12  ;;  %s1607_s17 = sand.u32 1, %s1112_s24  }
  0x3f   : > { %p1276_p11 = pnand %p1604_p10, %p1603_p6  ;;  %s301_s23 = sshll.u32 %s295_s1, 4  ;;  %s1287_s23 = int_to_ptr.vmem [resolvable:$true] %s301_s23 }
  0x40   : > { %s1291_s19 = scalar_lea.sflag [#allocation9], %s1607_s17 }
  0x41   : > { %s1605_s14 = scalar_select %p1276_p11, 1, 0 }
  0x43   : > { %s1284_s30 = scalar_lea.hbm %s1606_s3, %s1216_s11  ;;  %s889_s15 = scalar_lea.hbm %s1606_s3, 2688 }
  0x44   : > { %s884_s26 = scalar_lea.hbm %s1284_s30, 896  ;;  %p890_p8 = scmp.lt.u32.totalorder %s1284_s30, %s1606_s3 }
  0x45   : > { %p885_p13 = scmp.ne.s32.totalorder %s1284_s30, %s884_s26  ;;  %p891_p9 = scmp.lt.u32.totalorder %s889_s15, %s884_s26 }
  0x46   : > { %p893_p3 = scmp.lt.u32.totalorder %s884_s26, %s1284_s30 }
  0x47   : > { %p887_p0 = pnand %p885_p13, %p1245_p2  ;;  %p892_p1 = por %p891_p9, %p890_p8 }
  0x49   : > { %p888_p4 = pneg %p887_p0  ;;  %p894_p5 = por %p893_p3, %p892_p1 }
  0x4b   : > { %p895_p7 = pnand %p894_p5, %p888_p4 }
  0x4d   : > { %898 = shalt.err (!%p895_p7)
}
  0x4e   : > { %s899_s1 = scalar_lea.vmem %s1287_s23, 896  ;;  %s1118_s16 = smov [#allocation8]  }
  0x4f   : > { %p900_p6 = scmp.ne.s32.totalorder %s1287_s23, %s899_s1  ;;  %s904_s17 = sshll.u32 %s1118_s16, 4  ;;  %s905_s17 = int_to_ptr.vmem [resolvable:$false] %s904_s17 }
  0x50   : > { %s906_s27 = scalar_lea.vmem %s905_s17, 1792  ;;  %p907_p0 = scmp.lt.s32.totalorder %s1287_s23, %s905_s17 }
  0x51   : > { %p902_p10 = pnand %p900_p6, %p1245_p2  ;;  %p908_p11 = scmp.lt.s32.totalorder %s906_s27, %s899_s1 }
  0x53   : > { %p903_p13 = pneg %p902_p10  ;;  %p909_p8 = por %p908_p11, %p907_p0 }
  0x55   : > { %p910_p9 = pnand %p909_p8, %p903_p13 }
  0x57   : > { %913 = shalt.err (!%p910_p9)
}
  0x58   : > { %s1608_s26 = smov 8   ;;  %s1609_s18 = smov 128  }
  0x59   : > { %s1610_s29 = smov 384   ;;  %s1322_s1 = scalar_lea.hbm %s1569_s0, %s1216_s11 }
  0x5a   : > { %806 = dma.hbm_to_vmem [thread:$0]  (!%p1221_p12), %s1284_s30, 896, %s1287_s23, %s1291_s19, %s1610_s29, %s1609_s18, %s1608_s26  }
  0x5b   : > { %s235_s17 = scalar_lea.vmem [#allocation2], %s1219_s12  ;;  %s232_s3 = scalar_lea.sflag [#allocation3], %s1213_s10 }
  0x5c   : > { %s241_s27 = sshll.u32 %s235_s17, 4  ;;  %s914_s9 = scalar_lea.hbm %s1322_s1, 896  ;;  %s1325_s27 = int_to_ptr.vmem [resolvable:$true] %s241_s27 }
  0x5d   : > { %p915_p11 = scmp.ne.s32.totalorder %s1322_s1, %s914_s9  ;;  %s919_s15 = scalar_lea.hbm %s1569_s0, 2688 }
  0x5e   : > { %p920_p3 = scmp.lt.u32.totalorder %s1322_s1, %s1569_s0  ;;  %p921_p5 = scmp.lt.u32.totalorder %s919_s15, %s914_s9 }
  0x5f   : > { %p917_p4 = pnand %p915_p11, %p1245_p2  ;;  %p923_p6 = scmp.lt.u32.totalorder %s914_s9, %s1322_s1 }
  0x60   : > { %p922_p7 = por %p921_p5, %p920_p3 }
  0x61   : > { %p918_p1 = pneg %p917_p4 }
  0x62   : > { %p924_p10 = por %p923_p6, %p922_p7 }
  0x64   : > { %p925_p13 = pnand %p924_p10, %p918_p1 }
  0x66   : > { %928 = shalt.err (!%p925_p13)
}
  0x67   : > { %s929_s17 = scalar_lea.vmem %s1325_s27, 896  ;;  %s1119_s23 = smov [#allocation2]  }
  0x68   : > { %p930_p0 = scmp.ne.s32.totalorder %s1325_s27, %s929_s17  ;;  %s934_s30 = sshll.u32 %s1119_s23, 4  ;;  %s935_s30 = int_to_ptr.vmem [resolvable:$false] %s934_s30 }
  0x69   : > { %s936_s21 = scalar_lea.vmem %s935_s30, 1792  ;;  %p937_p11 = scmp.lt.s32.totalorder %s1325_s27, %s935_s30 }
  0x6a   : > { %p932_p8 = pnand %p930_p0, %p1245_p2  ;;  %p938_p4 = scmp.lt.s32.totalorder %s936_s21, %s929_s17 }
  0x6c   : > { %p933_p9 = pneg %p932_p8  ;;  %p939_p3 = por %p938_p4, %p937_p11 }
  0x6e   : > { %p940_p5 = pnand %p939_p3, %p933_p9 }
  0x70   : > { %943 = shalt.err (!%p940_p5)
}
  0x71   : > { %797 = dma.hbm_to_vmem [thread:$0]  (!%p1221_p12), %s1322_s1, 896, %s1325_s27, %s232_s3, %s1610_s29, %s1609_s18, %s1608_s26  }
  0x72   : > { %s1358_s16 = scalar_lea.hbm %s1571_s2, %s1216_s11  ;;  %s275_s17 = scalar_lea.vmem [#allocation7], %s1219_s12 }
  0x73   : > { %s281_s23 = sshll.u32 %s275_s17, 4  ;;  %s944_s30 = scalar_lea.hbm %s1358_s16, 896  ;;  %s1361_s23 = int_to_ptr.vmem [resolvable:$true] %s281_s23 }
  0x74   : > { %p945_p1 = scmp.ne.s32.totalorder %s1358_s16, %s944_s30  ;;  %s949_s1 = scalar_lea.hbm %s1571_s2, 2688 }
  0x75   : > { %p950_p10 = scmp.lt.u32.totalorder %s1358_s16, %s1571_s2  ;;  %p951_p13 = scmp.lt.u32.totalorder %s949_s1, %s944_s30 }
  0x76   : > { %p947_p7 = pnand %p945_p1, %p1245_p2  ;;  %p953_p8 = scmp.lt.u32.totalorder %s944_s30, %s1358_s16 }
  0x77   : > { %p952_p0 = por %p951_p13, %p950_p10 }
  0x78   : > { %p948_p6 = pneg %p947_p7 }
  0x79   : > { %p954_p9 = por %p953_p8, %p952_p0 }
  0x7b   : > { %p955_p11 = pnand %p954_p9, %p948_p6 }
  0x7d   : > { %958 = shalt.err (!%p955_p11)
}
  0x7e   : > { %s959_s15 = scalar_lea.vmem %s1361_s23, 896  ;;  %s1120_s17 = smov [#allocation7]  }
  0x7f   : > { %p960_p4 = scmp.ne.s32.totalorder %s1361_s23, %s959_s15  ;;  %s964_s21 = sshll.u32 %s1120_s17, 4  ;;  %s965_s21 = int_to_ptr.vmem [resolvable:$false] %s964_s21 }
  0x80   : > { %s966_s3 = scalar_lea.vmem %s965_s21, 1792  ;;  %p967_p1 = scmp.lt.s32.totalorder %s1361_s23, %s965_s21 }
  0x81   : > { %p962_p3 = pnand %p960_p4, %p1245_p2  ;;  %p968_p7 = scmp.lt.s32.totalorder %s966_s3, %s959_s15 }
  0x83   : > { %p963_p5 = pneg %p962_p3  ;;  %p969_p10 = por %p968_p7, %p967_p1 }
  0x85   : > { %p970_p13 = pnand %p969_p10, %p963_p5 }
  0x87   : > { %973 = shalt.err (!%p970_p13)
}
  0x88   : > { %803 = dma.hbm_to_vmem [thread:$0]  (!%p1221_p12), %s1358_s16, 896, %s1361_s23, %s1239_s20, %s1610_s29, %s1609_s18, %s1608_s26  }
  0x89   : > { %s1392_s27 = scalar_lea.hbm %s1573_s4, %s1216_s11  ;;  %s315_s9 = scalar_lea.vmem [#allocation10], %s1219_s12 }
  0x8a   : > { %s321_s15 = sshll.u32 %s315_s9, 4  ;;  %s974_s17 = scalar_lea.hbm %s1392_s27, 896  ;;  %s1395_s15 = int_to_ptr.vmem [resolvable:$true] %s321_s15 }
  0x8b   : > { %p975_p6 = scmp.ne.s32.totalorder %s1392_s27, %s974_s17  ;;  %s979_s16 = scalar_lea.hbm %s1573_s4, 2688 }
  0x8c   : > { %p980_p9 = scmp.lt.u32.totalorder %s1392_s27, %s1573_s4  ;;  %p981_p11 = scmp.lt.u32.totalorder %s979_s16, %s974_s17 }
  0x8d   : > { %p977_p0 = pnand %p975_p6, %p1245_p2  ;;  %p983_p3 = scmp.lt.u32.totalorder %s974_s17, %s1392_s27 }
  0x8e   : > { %p982_p4 = por %p981_p11, %p980_p9 }
  0x8f   : > { %p978_p8 = pneg %p977_p0 }
  0x90   : > { %p984_p5 = por %p983_p3, %p982_p4 }
  0x92   : > { %p985_p1 = pnand %p984_p5, %p978_p8 }
  0x94   : > { %988 = shalt.err (!%p985_p1)
}
  0x95   : > { %s989_s30 = scalar_lea.vmem %s1395_s15, 896  ;;  %s1121_s1 = smov [#allocation10]  }
  0x96   : > { %p990_p7 = scmp.ne.s32.totalorder %s1395_s15, %s989_s30  ;;  %s994_s9 = sshll.u32 %s1121_s1, 4  ;;  %s995_s9 = int_to_ptr.vmem [resolvable:$false] %s994_s9 }
  0x97   : > { %s996_s21 = scalar_lea.vmem %s995_s9, 1792  ;;  %p997_p6 = scmp.lt.s32.totalorder %s1395_s15, %s995_s9 }
  0x98   : > { %p992_p10 = pnand %p990_p7, %p1245_p2  ;;  %p998_p0 = scmp.lt.s32.totalorder %s996_s21, %s989_s30 }
  0x9a   : > { %p993_p13 = pneg %p992_p10  ;;  %p999_p9 = por %p998_p0, %p997_p6 }
  0x9c   : > { %p1000_p11 = pnand %p999_p9, %p993_p13 }
  0x9e   : > { %1003 = shalt.err (!%p1000_p11)
}
  0x9f   : > { %809 = dma.hbm_to_vmem [thread:$0]  (!%p1221_p12), %s1392_s27, 896, %s1395_s15, %s1291_s19, %s1610_s29, %s1609_s18, %s1608_s26  }
  0xa0   : > { %s1426_s16 = scalar_lea.hbm %s1574_s5, %s1216_s11  ;;  %s335_s23 = scalar_lea.vmem [#allocation11], %s1219_s12 }
  0xa1   : > { %s341_s3 = sshll.u32 %s335_s23, 4  ;;  %s332_s30 = scalar_lea.sflag [#allocation12], %s1213_s10  ;;  %s1429_s3 = int_to_ptr.vmem [resolvable:$true] %s341_s3 }
  0xa2   : > { %s1004_s1 = scalar_lea.hbm %s1426_s16, 896  ;;  %s1009_s15 = scalar_lea.hbm %s1574_s5, 2688 }
  0xa3   : > { %p1005_p8 = scmp.ne.s32.totalorder %s1426_s16, %s1004_s1  ;;  %p1010_p5 = scmp.lt.u32.totalorder %s1426_s16, %s1574_s5 }
  0xa4   : > { %p1011_p1 = scmp.lt.u32.totalorder %s1009_s15, %s1004_s1  ;;  %p1013_p10 = scmp.lt.u32.totalorder %s1004_s1, %s1426_s16 }
  0xa5   : > { %p1007_p4 = pnand %p1005_p8, %p1245_p2 }
  0xa6   : > { %p1012_p7 = por %p1011_p1, %p1010_p5 }
  0xa7   : > { %p1008_p3 = pneg %p1007_p4 }
  0xa8   : > { %p1014_p13 = por %p1013_p10, %p1012_p7 }
  0xaa   : > { %p1015_p6 = pnand %p1014_p13, %p1008_p3 }
  0xac   : > { %1018 = shalt.err (!%p1015_p6)
}
  0xad   : > { %s1019_s12 = scalar_lea.vmem %s1429_s3, 896  ;;  %s1122_s21 = smov [#allocation11]  }
  0xae   : > { %p1020_p0 = scmp.ne.s32.totalorder %s1429_s3, %s1019_s12  ;;  %s1024_s17 = sshll.u32 %s1122_s21, 4  ;;  %s1025_s17 = int_to_ptr.vmem [resolvable:$false] %s1024_s17 }
  0xaf   : > { %s1026_s20 = scalar_lea.vmem %s1025_s17, 1792  ;;  %p1027_p8 = scmp.lt.s32.totalorder %s1429_s3, %s1025_s17 }
  0xb0   : > { %p1022_p9 = pnand %p1020_p0, %p1245_p2  ;;  %p1028_p4 = scmp.lt.s32.totalorder %s1026_s20, %s1019_s12 }
  0xb2   : > { %p1023_p11 = pneg %p1022_p9  ;;  %p1029_p5 = por %p1028_p4, %p1027_p8 }
  0xb4   : > { %p1030_p1 = pnand %p1029_p5, %p1023_p11 }
  0xb6   : > { %1033 = shalt.err (!%p1030_p1)
}
  0xb7   : > { %812 = dma.hbm_to_vmem [thread:$0]  (!%p1221_p12), %s1426_s16, 896, %s1429_s3, %s332_s30, %s1610_s29, %s1609_s18, %s1608_s26  }
  0xb8   : > { %p1611_p2 = scmp.ne.s32.totalorder %s1605_s14, 0 }
  0xb9   : > { %s1461_s28 = sand.u32 (!%p1611_p2), 1, %s1104_s22   ;;  %p1612_p3 = scmp.ne.s32.totalorder (!%p1611_p2), %s1596_s7, 0 }
  0xba   : > { %353 = sbr.rel (%p1611_p2) target bundleno = 262 (0x106), region = 44  ;;  %s356_s1 = scalar_lea.sflag (!%p1611_p2), [#allocation3], %s1461_s28 }
  0xbb   : > { %s779_s23 = smul.u32 (!%p1611_p2), 56, %s1461_s28 }
  0xbd   : > { %s359_s13 = scalar_lea.vmem (!%p1611_p2), [#allocation2], %s779_s23 }
  0xc1   : > { %1079 = dma.done.wait (%p1612_p3), %s356_s1, 896  }
  0xc2   : > { %1081 = vsyncadd (%p1612_p3), %s356_s1, 4294966400  ;;  %s364_s10 = sand.u32 1, %s1180_s25   ;;  %s368_s14 = scalar_lea.vmem [#allocation5], %s779_s23 }
  0xc3   : > { %s365_s26 = scalar_lea.sflag [#allocation6], %s364_s10 }
  0xc4   : > { %1083 = dma.done.wait (%p1612_p3), %s365_s26, 1792  }
  0xc5   : > { %1085 = vsyncadd (%p1612_p3), %s365_s26, 4294965504  ;;  %s1474_s18 = scalar_lea.vmem [#allocation7], %s779_s23  ;;  %s383_s29 = scalar_lea.sflag [#allocation9], %s364_s10 }
  0xc6   : > { %s1476_s16 = scalar_lea.vmem [#allocation8], %s779_s23 }
  0xc7   : > { %1087 = dma.done.wait (%p1612_p3), %s383_s29, 1792  }
  0xc8   : > { %1089 = vsyncadd (%p1612_p3), %s383_s29, 4294965504  ;;  %s1482_s3 = scalar_lea.vmem [#allocation10], %s779_s23  ;;  %s401_s30 = scalar_lea.sflag [#allocation12], %s1461_s28 }
  0xc9   : > { %s1485_s19 = scalar_lea.vmem [#allocation11], %s779_s23 }
  0xca   : > { %1091 = dma.done.wait (%p1612_p3), %s401_s30, 896  }
  0xcb   : > { %1093 = vsyncadd (%p1612_p3), %s401_s30, 4294966400  ;;  %v457_v0 = vld [vmem:[%s359_s13] sm:$0xff]  ;;  %v458_v1 = vld [vmem:[%s359_s13 + $0x8] sm:$0xff]  ;;  %vm539_vm0 = vcmask 1041408   ;;  %s456_s7 = scalar_lea.vmem [#allocation13], %s1461_s28  ;;  %s770_s15 = sshll.u32 %s1180_s25, 4 }
  0xcc   : > { %v459_v2 = vld [vmem:[%s359_s13 + $0x10] sm:$0xff]  ;;  %v460_v3 = vld [vmem:[%s359_s13 + $0x18] sm:$0xff]  ;;  %v461_v4 = vld [vmem:[%s359_s13 + $0x20] sm:$0xff]  ;;  %s585_s27 = sshll.u32 %s456_s7, 4  ;;  %s1528_s12 = scalar_lea.hbm %s1575_s6, %s770_s15  ;;  %s1523_s27 = int_to_ptr.vmem [resolvable:$true] %s585_s27 }
  0xcd   : > { %v463_v5 = vld [vmem:[%s359_s13 + $0x30] sm:$0x3]  ;;  %v465_v7 = vld [vmem:[%s368_s14 + $0x8] sm:$0xff]  ;;  %v462_v8 = vld [vmem:[%s359_s13 + $0x28] sm:$0xff]  ;;  %s573_s21 = scalar_lea.sflag [#allocation4], %s1461_s28  ;;  %s1034_s17 = scalar_lea.vmem %s1523_s27, 16 }
  0xce   : > { %v464_v6 = vld [vmem:[%s368_s14] sm:$0xff]  ;;  %v466_v9 = vld [vmem:[%s368_s14 + $0x10] sm:$0xff]  ;;  %v467_v10 = vld [vmem:[%s368_s14 + $0x18] sm:$0xff]  ;;  %v472_v13 = vadd.f32 %v465_v7, %v458_v1  ;;  %p1035_p12 = scmp.ne.s32.totalorder %s1523_s27, %s1034_s17  ;;  %p1613_p7 = scmp.ne.s32.totalorder %s1597_s8, 0 }
  0xcf   : > { %v468_v11 = vld [vmem:[%s368_s14 + $0x20] sm:$0xff]  ;;  %v471_v12 = vadd.f32 %v464_v6, %v457_v0  ;;  %v469_v14 = vld [vmem:[%s368_s14 + $0x28] sm:$0xff]  ;;  %v470_v15 = vld [vmem:[%s368_s14 + $0x30] sm:$0x3]  ;;  %v473_v16 = vadd.f32 %v466_v9, %v459_v2  ;;  %v474_v17 = vadd.f32 %v467_v10, %v460_v3  ;;  %s1123_s25 = smov [#allocation13]  }
  0xd0   : > { %v478_v18 = vld [vmem:[%s1474_s18] sm:$0xff]  ;;  %v475_v19 = vadd.f32 %v468_v11, %v461_v4  ;;  %v479_v20 = vld [vmem:[%s1474_s18 + $0x8] sm:$0xff]  ;;  %v480_v21 = vld [vmem:[%s1474_s18 + $0x10] sm:$0xff]  ;;  %v477_v28 = vadd.f32 %v470_v15, %v463_v5  ;;  %v476_v34 = vadd.f32 %v469_v14, %v462_v8  ;;  %p1036_p10 = pnand %p1035_p12, %p1613_p7  ;;  %s1038_s20 = sshll.u32 %s1123_s25, 4  ;;  %s1039_s20 = int_to_ptr.vmem [resolvable:$false] %s1038_s20 }
  0xd1   : > { %v481_v22 = vld [vmem:[%s1474_s18 + $0x18] sm:$0xff]  ;;  %v485_v23 = vsub.f32 %v471_v12, %v478_v18  ;;  %v482_v24 = vld [vmem:[%s1474_s18 + $0x20] sm:$0xff]  ;;  %v484_v25 = vld [vmem:[%s1474_s18 + $0x30] sm:$0x3]  ;;  %v486_v26 = vsub.f32 %v472_v13, %v479_v20  ;;  %v487_v27 = vsub.f32 %v473_v16, %v480_v21  ;;  %s1040_s23 = scalar_lea.vmem %s1039_s20, 32  ;;  %p1041_p6 = scmp.lt.s32.totalorder %s1523_s27, %s1039_s20 }
  0xd2   : > { %v483_v29 = vld [vmem:[%s1474_s18 + $0x28] sm:$0xff]  ;;  %v492_v30 = vld [vmem:[%s1476_s16] sm:$0xff]  ;;  %v493_v31 = vld [vmem:[%s1476_s16 + $0x8] sm:$0xff]  ;;  %v488_v35 = vsub.f32 %v474_v17, %v481_v22  ;;  %v489_v40 = vsub.f32 %v475_v19, %v482_v24  ;;  %v491_v51 = vsub.f32 %v477_v28, %v484_v25  ;;  %p1037_p13 = pneg %p1036_p10  ;;  %p1042_p0 = scmp.lt.s32.totalorder %s1040_s23, %s1034_s17 }
  0xd3   : > { %v494_v32 = vld [vmem:[%s1476_s16 + $0x10] sm:$0xff]  ;;  %v527_v33 = vand.u32 2147483647, %v485_v23  ;;  %v495_v36 = vld [vmem:[%s1476_s16 + $0x18] sm:$0xff]  ;;  %v496_v37 = vld [vmem:[%s1476_s16 + $0x20] sm:$0xff]  ;;  %v490_v58 = vsub.f32 %v476_v34, %v483_v29 }
  0xd4   : > { %v497_v38 = vld [vmem:[%s1476_s16 + $0x28] sm:$0xff]  ;;  %v528_v39 = vand.u32 2147483647, %v486_v26  ;;  %v498_v41 = vld [vmem:[%s1476_s16 + $0x30] sm:$0x3]  ;;  %v500_v43 = vld [vmem:[%s1482_s3 + $0x8] sm:$0xff]  ;;  %p1043_p9 = por %p1042_p0, %p1041_p6 }
  0xd5   : > { %v499_v42 = vld [vmem:[%s1482_s3] sm:$0xff]  ;;  %v501_v44 = vld [vmem:[%s1482_s3 + $0x10] sm:$0xff]  ;;  %v502_v45 = vld [vmem:[%s1482_s3 + $0x18] sm:$0xff]  ;;  %v507_v48 = vadd.f32 %v500_v43, %v493_v31  ;;  %v529_v49 = vand.u32 2147483647, %v487_v27 }
  0xd6   : > { %v503_v46 = vld [vmem:[%s1482_s3 + $0x20] sm:$0xff]  ;;  %v506_v47 = vadd.f32 %v499_v42, %v492_v30  ;;  %v534_v50 = vadd.f32 %v528_v39, %v527_v33  ;;  %v504_v52 = vld [vmem:[%s1482_s3 + $0x28] sm:$0xff]  ;;  %v505_v53 = vld [vmem:[%s1482_s3 + $0x30] sm:$0x3]  ;;  %v508_v54 = vadd.f32 %v501_v44, %v494_v32  ;;  %v509_v55 = vadd.f32 %v502_v45, %v495_v36  ;;  %p1044_p11 = pnand %p1043_p9, %p1037_p13 }
  0xd7   : > { %v510_v56 = vadd.f32 %v503_v46, %v496_v37  ;;  %v513_v57 = vld [vmem:[%s1485_s19] sm:$0xff]  ;;  %v512_v59 = vadd.f32 %v505_v53, %v498_v41  ;;  %v514_v60 = vld [vmem:[%s1485_s19 + $0x8] sm:$0xff]  ;;  %v515_v61 = vld [vmem:[%s1485_s19 + $0x10] sm:$0xff]  ;;  %v530_v0 = vand.u32 2147483647, %v488_v35  ;;  %v511_v1 = vadd.f32 %v504_v52, %v497_v38 }
  0xd8   : > { %v516_v62 = vld [vmem:[%s1485_s19 + $0x18] sm:$0xff]  ;;  %v520_v63 = vsub.f32 %v506_v47, %v513_v57  ;;  %v517_v2 = vld [vmem:[%s1485_s19 + $0x20] sm:$0xff]  ;;  %v519_v3 = vld [vmem:[%s1485_s19 + $0x30] sm:$0x3]  ;;  %v521_v4 = vsub.f32 %v507_v48, %v514_v60  ;;  %v522_v5 = vsub.f32 %v508_v54, %v515_v61  ;;  %v531_v8 = vand.u32 2147483647, %v489_v40 }
  0xd9   : > { %v523_v6 = vsub.f32 %v509_v55, %v516_v62  ;;  %v518_v7 = vld [vmem:[%s1485_s19 + $0x28] sm:$0xff]  ;;  %v535_v9 = vadd.f32 %v534_v50, %v529_v49  ;;  %v524_v10 = vsub.f32 %v510_v56, %v517_v2  ;;  %v533_v11 = vand.u32 2147483647, %v491_v51 }
  0xda   : > { %v548_v12 = vand.u32 2147483647, %v520_v63  ;;  %v549_v13 = vand.u32 2147483647, %v521_v4  ;;  %v526_v14 = vsub.f32 %v512_v59, %v519_v3  ;;  %v532_v15 = vand.u32 2147483647, %v490_v58 }
  0xdb   : > { %v536_v16 = vadd.f32 %v535_v9, %v530_v0  ;;  %v550_v17 = vand.u32 2147483647, %v522_v5  ;;  %v525_v18 = vsub.f32 %v511_v1, %v518_v7  ;;  %v551_v19 = vand.u32 2147483647, %v523_v6 }
  0xdc   : > { %v555_v20 = vadd.f32 %v549_v13, %v548_v12  ;;  %v540_v22 = vsel %vm539_vm0, %v533_v11, 0.0  ;;  %v552_v23 = vand.u32 2147483647, %v524_v10  ;;  %v554_v26 = vand.u32 2147483647, %v526_v14 }
  0xdd   : > { %v537_v21 = vadd.f32 %v536_v16, %v531_v8  ;;  %v553_v27 = vand.u32 2147483647, %v525_v18 }
  0xde   : > { %v556_v24 = vadd.f32 %v555_v20, %v550_v17  ;;  %v560_v32 = vsel %vm539_vm0, %v554_v26, 0.0 }
  0xdf   : > { %v538_v25 = vadd.f32 %v537_v21, %v532_v15 }
  0xe0   : > { %v557_v28 = vadd.f32 %v556_v24, %v551_v19 }
  0xe1   : > { %v541_v29 = vadd.f32 %v540_v22, %v538_v25 }
  0xe2   : > { %v558_v30 = vadd.f32 %v557_v28, %v552_v23 }
  0xe3   : > { %v542_v31 = vrot.slane %v541_v29, 4 }
  0xe4   : > { %v559_v33 = vadd.f32 %v558_v30, %v553_v27 }
  0xe5   : > { %v543_v34 = vadd.f32 %v542_v31, %v541_v29 }
  0xe6   : > { %v561_v35 = vadd.f32 %v560_v32, %v559_v33 }
  0xe7   : > { %v544_v36 = vrot.slane %v543_v34, 2 }
  0xe8   : > { %v562_v37 = vrot.slane %v561_v35, 4 }
  0xe9   : > { %v545_v38 = vadd.f32 %v544_v36, %v543_v34 }
  0xea   : > { %v563_v39 = vadd.f32 %v562_v37, %v561_v35 }
  0xeb   : > { %v546_v40 = vrot.slane %v545_v38, 1 }
  0xec   : > { %v564_v41 = vrot.slane %v563_v39, 2 }
  0xed   : > { %v547_v42 = vadd.f32 %v546_v40, %v545_v38 }
  0xee   : > { %v565_v43 = vadd.f32 %v564_v41, %v563_v39 }
  0xef   : > { %v568_v45 = vadd.f32 1.0, %v547_v42 }
  0xf0   : > { %v566_v44 = vrot.slane %v565_v43, 1 }
  0xf2   : > { %v567_v46 = vadd.f32 %v566_v44, %v565_v43 }
  0xf4   : > { %v569_v47 = vsub.f32 %v568_v45, %v567_v46 }
  0xf6   : > { %v570_v48 = vmax.f32 %v569_v47, 0.0 }
  0xf8   : > { %571 = vst [vmem:[%s456_s7] sm:$0x1] %v570_v48 }
  0xf9   : > { %1047 = shalt.err (!%p1044_p11)
}
  0xfa   : > { %s1048_s28 = scalar_lea.hbm %s1528_s12, 16  ;;  %s1052_s10 = scalar_lea.hbm %s1575_s6, 48 }
  0xfb   : > { %p1049_p8 = scmp.ne.s32.totalorder %s1528_s12, %s1048_s28  ;;  %p1053_p1 = scmp.lt.u32.totalorder %s1528_s12, %s1575_s6 }
  0xfc   : > { %p1054_p2 = scmp.lt.u32.totalorder %s1052_s10, %s1048_s28  ;;  %p1056_p12 = scmp.lt.u32.totalorder %s1048_s28, %s1528_s12 }
  0xfd   : > { %p1050_p4 = pnand %p1049_p8, %p1613_p7 }
  0xfe   : > { %p1055_p3 = por %p1054_p2, %p1053_p1 }
  0xff   : > { %p1051_p5 = pneg %p1050_p4 }
 0x100   : > { %p1057_p10 = por %p1056_p12, %p1055_p3 }
 0x102   : > { %p1058_p13 = pnand %p1057_p10, %p1051_p5 }
 0x104   : > { %1061 = shalt.err (!%p1058_p13)
}
 0x105   : > { %792 = dma.vmem_to_hbm [thread:$0]  (%p1613_p7), %s1523_s27, 16, %s1528_s12, %s573_s21  }
 0x106 PF: > { %s1614_s18 = sld [smem:[#allocation19_spill]]  ;;  %s1615_s29 = sld [smem:[#allocation23_spill]] }
 0x107   : > { %p818_p6 = scmp.ge.s32.totalorder %s1112_s24, 2 }
 0x10c   : > { %s597_s16 = sand.u32 1, %s1614_s18   ;;  %p1616_p0 = scmp.ne.s32.totalorder %s1615_s29, 0 }
 0x10d   : > { %s598_s3 = scalar_lea.sflag [#allocation4], %s597_s16 }
 0x10e   : > { %p814_p9 = pnand %p818_p6, %p1616_p0 }
 0x110   : > { %1095 = dma.done.wait (!%p814_p9), %s598_s3, 16  }
 0x111   : > { %1097 = vsyncadd (!%p814_p9), %s598_s3, 4294967280  ;;  %s1617_s24 = sld [smem:[#allocation21_spill]]  ;;  %s1618_s30 = sld [smem:[#allocation20_spill]] }
 0x112   : > { %s1619_s23 = sld [smem:[#allocation22_spill]]  ;;  %s1620_s21 = smov %s1104_s22 }
 0x117   : > { %p28_p11 = scmp.ge.s32.totalorder %s1617_s24, 5   ;;  %s1621_s22 = smov %s1618_s30 }
 0x119   :  { %30 = sbr.rel (!%p28_p11) target bundleno = 14 (0xe), region = 150 }
 0x120   :  { %602 = vsyncpa [#allocation3], 1 }
 0x121   :  { %604 = vsyncpa [#allocation3 + $0x1], 1 }
 0x122   :  { %605 = vsyncpa [#allocation6], 1 }
 0x123   :  { %607 = vsyncpa [#allocation6 + $0x1], 1 }
 0x124   :  { %608 = vsyncpa [#allocation9], 1 }
 0x125   :  { %610 = vsyncpa [#allocation9 + $0x1], 1 }
 0x126   :  { %611 = vsyncpa [#allocation12], 1 }
 0x127   :  { %613 = vsyncpa [#allocation12 + $0x1], 1 }
 0x128   :  { %614 = vsyncpa [#allocation4], 1 }
 0x129   :  { %616 = vsyncpa [#allocation4 + $0x1], 1 }

</bundles_post_ra>
